<compile_context>
chip_gen: v6e
topology: v6e:2x2x1
jax: 0.10.0
libtpu: 0.0.40
codegen_flags: <defaults>
</compile_context>

<pallas_src>
import functools

import jax
import jax.numpy as jnp
from jax import lax
from jax.experimental import pallas as pl
from jax.experimental.pallas import tpu as pltpu

LANE = 128
SUBLANE = 8


def _round_up(x, m):
    return (x + m - 1) // m * m


def _tile_bytes(rows, cols, itemsize):
    """VMEM bytes a (rows, cols) block occupies: minor dim pads to 128 lanes,
    second-minor to 8 sublanes (conservative f32 rule for all dtypes)."""
    return _round_up(max(rows, 1), SUBLANE) * _round_up(max(cols, 1), LANE) * itemsize


def _vmem_capacity_bytes():
    try:
        return int(pltpu.get_tpu_info().vmem_capacity_bytes)
    except Exception:
        return 128 * 2**20  # v5e / v6e per-core VMEM (safe fallback)


def _disc_kernel(x_ref, w1_ref, b1_ref, w2_ref, b2_ref, o_ref, *, compute_dtype):
    # x_ref:  (TB, d)  activation block (caller's storage dtype)
    # w1_ref: (d, n)   first-layer weight, pre-transposed (compute_dtype)
    # b1_ref: (1, n)   first-layer bias (f32)
    # w2_ref: (1, n)   second-layer weight as a lane-dense row (f32)
    # b2_ref: (1,)     second-layer bias, SMEM scalar
    # o_ref:  (1, TB)  lane-dense output row for this batch block
    xv = x_ref[...]
    if xv.dtype != compute_dtype:
        xv = xv.astype(compute_dtype)  # cast in VMEM; no extra HBM pass

    # Linear(d, n) on the MXU, f32 accumulation; bias add + ReLU in f32.
    h = jnp.dot(xv, w1_ref[...], preferred_element_type=jnp.float32)
    h = jnp.maximum(h + b1_ref[...], 0.0)  # ReLU(ReLU(.)) == ReLU(.)

    # Linear(n, 1) as (1, n) . (TB, n)^T -> (1, TB).  Same contraction pattern
    # as flash-attention's q.k^T (MXU transposed-RHS path, no XLU transpose of
    # h); result is a lane-dense row -> unmasked vector stores.
    out = lax.dot_general(
        w2_ref[...], h,
        dimension_numbers=(((1,), (1,)), ((), ())),
        preferred_element_type=jnp.float32,
    )                                                       # (1, TB)
    o_ref[...] = (out + b2_ref[0]).astype(o_ref.dtype)


def _pick_block_b(B, small_vmem):
    if B <= 1024:
        return _round_up(B, SUBLANE)          # one small block; overhead moot
    target = 8192 if small_vmem else 16384    # >= ~0.5-1 MiB of x per step
    if small_vmem:
        # v7x: keep >= 2 grid steps so ("parallel",) shards across both TCs.
        target = min(target, _round_up(pl.cdiv(B, 2), LANE))
    return min(target, _round_up(B, SUBLANE))


def discriminator_forward(x, w1, b1, w2, b2, *, block_b=None, compute_dtype=None):
    """Forward of the PyTorch Discriminator.

    x:  (B, d)            input (f32, or bf16 if the caller stores it that way)
    w1: (n, d), b1: (n,)  first nn.Linear (PyTorch storage layout)
    w2: (1, n), b2: (1,)  second nn.Linear
    compute_dtype: dtype fed to the MXU for x / w1.  None -> x's dtype
        (f32 bit-faithful path).  Passing jnp.bfloat16 is a *precision mode*
        (weights + activations rounded to bf16, f32 accumulation); it only
        saves HBM traffic when x is already stored bf16 upstream (worth doing
        on v5e/v6e/v7x in that case).
    Returns: (B,) float32 -- identical semantics to the PyTorch module.
    """
    B, d = x.shape
    n = w1.shape[0]

    # torch `.float()` semantics for exotic input dtypes (no-op for f32/bf16).
    if x.dtype not in (jnp.float32, jnp.bfloat16):
        x = x.astype(jnp.float32)
    if compute_dtype is None:
        compute_dtype = x.dtype
    compute_dtype = jnp.dtype(compute_dtype)

    vmem_cap = _vmem_capacity_bytes()
    small_vmem = vmem_cap < 100 * 2**20       # v7x-class core (64 MiB VMEM)

    # ---- batch block size ----------------------------------------------------
    if block_b is None:
        block_b = _pick_block_b(B, small_vmem)
    assert block_b % SUBLANE == 0, "block_b must be a multiple of 8 (f32 sublanes)"
    num_blocks = pl.cdiv(B, block_b)
    # NOTE: the last x block may extend past row B (partial trailing block);
    # those rows are unspecified but row-independent and sliced off below.

    # ---- parameter layout glue (all tiny; x itself is never copied) -----------
    w1_t = jnp.asarray(w1, jnp.float32).T.astype(compute_dtype)   # (d, n)
    b1_r = jnp.asarray(b1, jnp.float32).reshape(1, n)             # (1, n)
    w2_r = jnp.asarray(w2, jnp.float32).reshape(1, n)             # (1, n) row
    b2_r = jnp.asarray(b2, jnp.float32).reshape(1)                # (1,) -> SMEM

    # ---- lane-padding-aware VMEM budget + cost hint ----------------------------
    x_item = jnp.dtype(x.dtype).itemsize
    w_item = jnp.dtype(compute_dtype).itemsize
    vmem_est = (2 * _tile_bytes(block_b, d, x_item)   # x block, double-buffered
                + 2 * _tile_bytes(block_b, n, 4)      # h intermediate (2x headroom)
                + 2 * _tile_bytes(1, block_b, 4)      # lane-dense out row, 2 bufs
                + 2 * _tile_bytes(d, n, w_item)       # w1^T
                + 4 * _tile_bytes(1, n, 4))           # b1, w2
    vmem_cap_limit = (48 * 2**20) if small_vmem else (100 * 2**20)
    vmem_limit = int(min(vmem_cap_limit,
                         max(int(1.25 * vmem_est) + (2 << 20), 16 * 2**20)))

    cost = pl.CostEstimate(
        flops=2 * B * d * n + 2 * B * n,
        transcendentals=0,
        bytes_accessed=(B * d * x_item + d * n * w_item + 2 * n * 4 + 4
                        + num_blocks * block_b * 4),
    )

    kernel = functools.partial(_disc_kernel, compute_dtype=compute_dtype)
    out = pl.pallas_call(
        kernel,
        out_shape=jax.ShapeDtypeStruct((num_blocks, block_b), jnp.float32),
        grid_spec=pltpu.PrefetchScalarGridSpec(
            num_scalar_prefetch=0,
            grid=(num_blocks,),
            in_specs=[
                pl.BlockSpec((block_b, d), lambda i: (i, 0)),        # x, batch-tiled
                pl.BlockSpec((d, n), lambda i: (0, 0)),              # w1^T (grid-invariant)
                pl.BlockSpec((1, n), lambda i: (0, 0)),              # b1
                pl.BlockSpec((1, n), lambda i: (0, 0)),              # w2 row
                pl.BlockSpec(memory_space=pltpu.MemorySpace.SMEM),   # b2 scalar
            ],
            out_specs=pl.BlockSpec((1, block_b), lambda i: (i, 0)),  # lane-dense rows
        ),
        compiler_params=pltpu.CompilerParams(
            dimension_semantics=("parallel",),
            vmem_limit_bytes=vmem_limit,
        ),
        cost_estimate=cost,
    )(x, w1_t, b1_r, w2_r, b2_r)

    # torch.reshape(outputs, [-1]) + .float(); drop the partial-block tail.
    return out.reshape(-1)[:B].astype(jnp.float32)


if __name__ == "__main__":
    key = jax.random.PRNGKey(0)
    kx, kw1, kb1, kw2, kb2, kx2 = jax.random.split(key, 6)

    d, n = 16, 32
    # Deterministic synthetic parameters (PyTorch nn.Linear storage layout).
    w1 = jax.random.normal(kw1, (n, d), dtype=jnp.float32) * 0.1   # Linear(d, n).weight
    b1 = jax.random.normal(kb1, (n,), dtype=jnp.float32) * 0.1     # Linear(d, n).bias
    w2 = jax.random.normal(kw2, (1, n), dtype=jnp.float32) * 0.1   # Linear(n, 1).weight
    b2 = jax.random.normal(kb2, (1,), dtype=jnp.float32) * 0.1     # Linear(n, 1).bias

    def ref_fwd(xx):
        h = jnp.maximum(xx.astype(jnp.float32) @ w1.T + b1, 0.0)
        return (h @ w2.T + b2).reshape(-1)

    # 1) Small batch (single block) -- typical usage.
    B1 = 8
    x1 = jax.random.normal(kx, (B1, d), dtype=jnp.float32)
    out1 = jax.block_until_ready(discriminator_forward(x1, w1, b1, w2, b2))
    assert out1.shape == (B1,)
    assert jnp.allclose(out1, ref_fwd(x1), atol=1e-5, rtol=1e-5)

    # 2) Ragged batch, single partial block (B=1000 rounds to a 1008-row block;
    #    the 8 out-of-range rows are discarded by the final slice).
    B2 = 1000
    x2 = jax.random.normal(kx2, (B2, d), dtype=jnp.float32)
    out2 = jax.block_until_ready(discriminator_forward(x2, w1, b1, w2, b2))
    assert out2.shape == (B2,)
    assert jnp.allclose(out2, ref_fwd(x2), atol=1e-5, rtol=1e-5)

    # 3) Forced tiling (grid of 2, partial trailing block) -- exercises the
    #    multi-block "parallel" path and the lane-dense (1, block_b) stores.
    out3 = jax.block_until_ready(
        discriminator_forward(x2, w1, b1, w2, b2, block_b=512))
    assert out3.shape == (B2,)
    assert jnp.allclose(out3, ref_fwd(x2), atol=1e-5, rtol=1e-5)

    # 4) bf16 MXU-feed precision mode: in-kernel cast of x, bf16 w1, f32 accum.
    out4 = jax.block_until_ready(
        discriminator_forward(x2, w1, b1, w2, b2, compute_dtype=jnp.bfloat16))
    assert out4.shape == (B2,)
    assert jnp.allclose(out4, ref_fwd(x2), atol=5e-2, rtol=5e-2)

    print("KERNEL_OK")
</pallas_src>

<mosaic_0001>
module attributes {stable_mosaic.version = 11 : i64} {
  func.func @_disc_kernel(%arg0: i32, %arg1: memref<8x16xf32, #tpu.memory_space<vmem>>, %arg2: memref<16x32xf32, #tpu.memory_space<vmem>>, %arg3: memref<1x32xf32, #tpu.memory_space<vmem>>, %arg4: memref<1x32xf32, #tpu.memory_space<vmem>>, %arg5: memref<1xf32, #tpu.memory_space<smem>>, %arg6: memref<1x8xf32, #tpu.memory_space<vmem>>) attributes {dimension_semantics = [#tpu.dimension_semantics<parallel>], iteration_bounds = array<i64: 1>, scalar_prefetch = 0 : i64, scratch_operands = 0 : i64, tpu.core_type = #tpu.core_type<tc>, window_params = [{transform_indices = @transform_0, window_bounds = array<i64: 8, 16>}, {pipeline_mode = #tpu.pipeline_mode<synchronous>, transform_indices = @transform_1, window_bounds = array<i64: 16, 32>}, {pipeline_mode = #tpu.pipeline_mode<synchronous>, transform_indices = @transform_2, window_bounds = array<i64: 1, 32>}, {pipeline_mode = #tpu.pipeline_mode<synchronous>, transform_indices = @transform_3, window_bounds = array<i64: 1, 32>}, {transform_indices = @transform_4, window_bounds = array<i64: 1>}, {transform_indices = @transform_5, window_bounds = array<i64: 1, 8>}]} {
    %c0 = arith.constant 0 : index
    %c0_0 = arith.constant 0 : index
    %0 = vector.load %arg1[%c0, %c0_0] : memref<8x16xf32, #tpu.memory_space<vmem>>, vector<8x16xf32>
    %c0_1 = arith.constant 0 : index
    %c0_2 = arith.constant 0 : index
    %1 = vector.load %arg2[%c0_1, %c0_2] : memref<16x32xf32, #tpu.memory_space<vmem>>, vector<16x32xf32>
    %cst = arith.constant dense<0.000000e+00> : vector<8x32xf32>
    %2 = tpu.matmul %0, %1, %cst {dimension_numbers = #tpu.dot_dimension_numbers<[1], [0], [0], [1], [0, 0, 1, 1], [], []>} : vector<8x16xf32>, vector<16x32xf32>, vector<8x32xf32> -> vector<8x32xf32>
    %c0_3 = arith.constant 0 : index
    %c0_4 = arith.constant 0 : index
    %3 = vector.load %arg3[%c0_3, %c0_4] : memref<1x32xf32, #tpu.memory_space<vmem>>, vector<1x32xf32>
    %4 = vector.broadcast %3 : vector<1x32xf32> to vector<8x32xf32>
    %5 = arith.addf %2, %4 : vector<8x32xf32>
    %cst_5 = arith.constant 0.000000e+00 : f32
    %6 = vector.broadcast %cst_5 : f32 to vector<8x32xf32>
    %7 = arith.maximumf %5, %6 : vector<8x32xf32>
    %c0_6 = arith.constant 0 : index
    %c0_7 = arith.constant 0 : index
    %8 = vector.load %arg4[%c0_6, %c0_7] : memref<1x32xf32, #tpu.memory_space<vmem>>, vector<1x32xf32>
    %cst_8 = arith.constant dense<0.000000e+00> : vector<1x8xf32>
    %9 = tpu.matmul %8, %7, %cst_8 {dimension_numbers = #tpu.dot_dimension_numbers<[1], [1], [0], [0], [0, 0, 1, 0], [], []>} : vector<1x32xf32>, vector<8x32xf32>, vector<1x8xf32> -> vector<1x8xf32>
    %c0_9 = arith.constant 0 : index
    %10 = memref.load %arg5[%c0_9] : memref<1xf32, #tpu.memory_space<smem>>
    %11 = vector.broadcast %10 : f32 to vector<1x8xf32>
    %12 = arith.addf %9, %11 : vector<1x8xf32>
    %c0_10 = arith.constant 0 : index
    %c0_11 = arith.constant 0 : index
    %13 = vector.load %arg6[%c0_10, %c0_11] : memref<1x8xf32, #tpu.memory_space<vmem>>, vector<1x8xf32>
    tpu.vector_store %arg6[%c0_10, %c0_11], %12 {strides = array<i32>} : memref<1x8xf32, #tpu.memory_space<vmem>>, vector<1x8xf32>,
    return
  }
  func.func @transform_0(%arg0: i32) -> (i32, i32) {
    %c0_i32 = arith.constant 0 : i32
    %c0_i32_0 = arith.constant 0 : i32
    return %arg0, %c0_i32 : i32, i32
  }
  func.func @transform_1(%arg0: i32) -> (i32, i32) {
    %c0_i32 = arith.constant 0 : i32
    %c0_i32_0 = arith.constant 0 : i32
    %c0_i32_1 = arith.constant 0 : i32
    return %c0_i32, %c0_i32_0 : i32, i32
  }
  func.func @transform_2(%arg0: i32) -> (i32, i32) {
    %c0_i32 = arith.constant 0 : i32
    %c0_i32_0 = arith.constant 0 : i32
    %c0_i32_1 = arith.constant 0 : i32
    return %c0_i32, %c0_i32_0 : i32, i32
  }
  func.func @transform_3(%arg0: i32) -> (i32, i32) {
    %c0_i32 = arith.constant 0 : i32
    %c0_i32_0 = arith.constant 0 : i32
    %c0_i32_1 = arith.constant 0 : i32
    return %c0_i32, %c0_i32_0 : i32, i32
  }
  func.func @transform_4(%arg0: i32) -> i32 {
    %c0_i32 = arith.constant 0 : i32
    %c0_i32_0 = arith.constant 0 : i32
    return %c0_i32 : i32
  }
  func.func @transform_5(%arg0: i32) -> (i32, i32) {
    %c0_i32 = arith.constant 0 : i32
    %c0_i32_0 = arith.constant 0 : i32
    return %arg0, %c0_i32 : i32, i32
  }
}

</mosaic_0001>

<bundles_post_ra>
// kernel: tpu_custom_call.1
= control target key start
LH: loop header
LB: loop body
LE: loop exit
PB: predicated region body
PF: predicated region fallthrough
CT: control target
= control target key end

     0   :  { %11 = vsyncpa [#allocation4], 0  ;;  %s380_s0 = inlined_call_operand.hbm [shape: f32[8,16], index: 0, kind: input, shape index: {}]   ;;  %s381_s1 = inlined_call_operand.hbm [shape: f32[16,32], index: 1, kind: input, shape index: {}]   ;;  %s382_s2 = inlined_call_operand.vmem [shape: f32[1,32], index: 2, kind: input, shape index: {}]   ;;  %s383_s3 = inlined_call_operand.vmem [shape: f32[1,32], index: 3, kind: input, shape index: {}]   ;;  %s384_s4 = inlined_call_operand.<no memory space> [shape: f32[1], index: 4, kind: input, shape index: {}]   ;;  %s385_s5 = inlined_call_operand.hbm [shape: f32[1,8], index: 5, kind: output, shape index: {}]  }
   0x1   :  { %12 = vsyncpa [#allocation7], 0 }
   0x2   :  { %13 = vsyncpa [#allocation5], 0  ;;  %s325_s18 = smov [#allocation3]   ;;  %s326_s20 = smov [#allocation6]  }
   0x3   :  { %s20_s19 = sshll.u32 %s325_s18, 4  ;;  %s29_s21 = sshll.u32 %s326_s20, 4  ;;  %s21_s19 = int_to_ptr.vmem [resolvable:$true] %s20_s19  ;;  %s30_s21 = int_to_ptr.vmem [resolvable:$true] %s29_s21 }
   0x4   :  { %s267_s22 = scalar_lea.vmem %s21_s19, 128  ;;  %p272_p1 = scmp.lt.s32.totalorder %s21_s19, %s21_s19 }
   0x5   :  { %p268_p0 = scmp.ne.s32.totalorder %s21_s19, %s267_s22  ;;  %p273_p2 = scmp.lt.s32.totalorder %s267_s22, %s267_s22 }
   0x7   :  { %p274_p3 = por %p273_p2, %p272_p1 }
   0x9   :  { %p275_p4 = pnand %p274_p3, %p268_p0 }
   0xb   :  { %278 = shalt.err (!%p275_p4)
}
   0xc   :  { %23 = dma.hbm_to_vmem [thread:$0]  %s380_s0, 128, %s21_s19, [#allocation4]  }
   0xd   :  { %s287_s25 = scalar_lea.vmem %s30_s21, 256  ;;  %p292_p6 = scmp.lt.s32.totalorder %s30_s21, %s30_s21 }
   0xe   :  { %p288_p5 = scmp.ne.s32.totalorder %s30_s21, %s287_s25  ;;  %p293_p7 = scmp.lt.s32.totalorder %s287_s25, %s287_s25 }
  0x10   :  { %p294_p8 = por %p293_p7, %p292_p6 }
  0x12   :  { %p295_p9 = pnand %p294_p8, %p288_p5 }
  0x14   :  { %298 = shalt.err (!%p295_p9)
}
  0x15   :  { %s327_s26 = smov 128   ;;  %s328_s27 = smov 8  }
  0x16   :  { %35 = dma.hbm_to_vmem [thread:$0]  %s381_s1, 256, %s30_s21, [#allocation7], %s327_s26, %s327_s26, %s328_s27  }
  0x17   :  { %319 = dma.done.wait [#allocation4], 128  }
  0x18   :  { %320 = vsyncadd [#allocation4], 4294967168 }
  0x19   :  { %321 = dma.done.wait [#allocation7], 256  }
  0x1a   :  { %322 = vsyncadd [#allocation7], 4294967040  ;;  %v329_v0 = vmov 0.0   ;;  %vm330_vm0 = vmmov 0   ;;  %v50_v1 = vld [vmem:[#allocation6 + $0x8] sm:$0xff]  ;;  %v49_v2 = vld [vmem:[#allocation6] sm:$0xff]  ;;  %v135_v10 = vstv %s384_s4 }
  0x1b   :  { %240 = vmatprep.subr.mxu0 %v329_v0  ;;  %244 = vmatprep.mubr.msk.f32.mxu0 %vm330_vm0, %v329_v0  ;;  %v48_v3 = vld [vmem:[#allocation3] sm:$0xff]  ;;  %vm58_vm1 = vcmask 130048   ;;  %vm136_vm2 = vcmask 261120   ;;  %s331_s9 = smov [#allocation8]   ;;  %vm213_vm3 = vcmask 57344  }
  0x1c   :  { %247 = vmatprep.subr.mxu1 %v329_v0  ;;  %249 = vmatprep.mubr.msk.f32.mxu1 %vm330_vm0, %v329_v0  ;;  %v231_v4 = vld [vmem:[%s382_s2] ss:$0 sm:$0xff]  ;;  %s221_s10 = sshll.u32 %s331_s9, 4  ;;  %s222_s10 = int_to_ptr.vmem [resolvable:$true] %s221_s10 }
  0x1d   :  { %241 = vmatpush3.msra.mxu0 %v50_v1  ;;  %v133_v9 = vld [vmem:[%s383_s3] sm:$0x1]  ;;  %s299_s2 = scalar_lea.vmem %s222_s10, 16  ;;  %s303_s11 = scalar_lea.vmem %s222_s10, 32 }
  0x1e   :  { %242 = vmatprep.subr.mxu0 %v329_v0  ;;  %p300_p10 = scmp.ne.s32.totalorder %s222_s10, %s299_s2  ;;  %p304_p11 = scmp.lt.s32.totalorder %s222_s10, %s222_s10 }
  0x1f   :  { %243 = vmatpush3.msra.mxu0 %v49_v2  ;;  %p305_p12 = scmp.lt.s32.totalorder %s303_s11, %s299_s2 }
  0x20   :  { %245 = vmatmul.mubr.msk.f32.vlgmr.msra.gmra.mxu0 %vm58_vm1, %v48_v3 }
  0x21   :  { %p306_p13 = por %p305_p12, %p304_p11 }
  0x23   :  { %p307_p0 = pnand %p306_p13, %p300_p10 }
  0xe0   :  { %v128_v5 = vpop.f32.mrf.mxu0 }
  0xe1   :  { %v129_v6 = vadd.f32 %v231_v4, %v128_v5 }
  0xe2   :  { %v246_v7 = vpop.f32.mrf.mxu0 }
  0xe3   :  { %v132_v8 = vmax.f32 %v129_v6, 0.0 }
  0xe5   :  { %248 = vmatpush3.xpose.msk.msra.mxu1 %vm136_vm2, %v132_v8 }
  0xe8   :  { %250 = vmatmul.mubr.msk.f32.vlgmr.msra.gmra.mxu1 %vm136_vm2, %v133_v9 }
 0x1a8   :  { %v209_v11 = vpop.f32.mrf.mxu1 }
 0x1a9   :  { %v210_v12 = vadd.f32 %v209_v11, %v135_v10 }
 0x1aa   :  { %v251_v13 = vpop.f32.mrf.mxu1 }
 0x1ab   :  { %214 = vst.msk [vmem:[#allocation8] sm:$0x1] %vm213_vm3, %v210_v12 }
 0x1ac   :  { %310 = shalt.err (!%p307_p0)
}
 0x1ad   :  { %224 = dma.vmem_to_hbm [thread:$0]  %s222_s10, 16, %s385_s5, [#allocation5]  }
 0x1ae   :  { %323 = dma.done.wait [#allocation5], 16  }
 0x1af   :  { %324 = vsyncadd [#allocation5], 4294967280 }
 0x1b0   :  { %228 = vsyncpa [#allocation4], 1 }
 0x1b1   :  { %229 = vsyncpa [#allocation7], 1 }
 0x1b2   :  { %230 = vsyncpa [#allocation5], 1 }

</bundles_post_ra>
